<compile_context>
chip_gen: v7x
topology: tpu7x:2x2x1
jax: 0.10.0
libtpu: 0.0.40
codegen_flags: <defaults>
</compile_context>

<pallas_src>
import functools
from typing import Optional

import jax
import jax.numpy as jnp
import numpy as np
from jax import lax
from jax.experimental import pallas as pl
from jax.experimental.pallas import tpu as pltpu

ALPHA = 1.0  # GaussianKernel(track_running_stats=True, alpha=1.0) default


def _round_up(x: int, m: int) -> int:
    return (x + m - 1) // m * m


def _vmem_limit_bytes() -> int:
    """Generation-aware VMEM limit: ~75% of physical, capped at 100 MiB."""
    phys = 64 * 1024 * 1024
    try:
        info = pltpu.get_tpu_info()
        phys = int(getattr(info, "vmem_capacity_bytes", phys))
    except Exception:
        pass
    return min(phys * 3 // 4, 100 * 1024 * 1024)


def _gaussian_tile_kernel(scale_ref, xr_ref, xc_ref, nr_ref, nc_ref, out_ref,
                          acc_ref=None, *, use_bf16_gram: bool = False):
    xr = xr_ref[...]
    xc = xc_ref[...]
    if use_bf16_gram:
        xr = xr.astype(jnp.bfloat16)
        xc = xc.astype(jnp.bfloat16)

    # Gram block on the MXU; contracting dims (1, 1) — no explicit transpose.
    gram = lax.dot_general(
        xr, xc,
        dimension_numbers=(((1,), (1,)), ((), ())),
        preferred_element_type=jnp.float32)                      # (tm, tn)

    def _finalize(g):
        # Pairwise squared L2 from precomputed norms (both orientations, so
        # only VPU adds here). Clamp tiny negatives from the rearrangement.
        l2 = jnp.maximum(nr_ref[...] + nc_ref[...] - 2.0 * g, 0.0)
        # scale = -1 / (2 * sigma^2), precomputed once in the wrapper (SMEM).
        out_ref[...] = jnp.exp(l2 * scale_ref[0, 0])

    if acc_ref is None:
        # Full feature dimension in a single block: no accumulator traffic.
        _finalize(gram)
    else:
        # K-tiled features: accumulate partial Gram, finalize on last step.
        k = pl.program_id(2)

        @pl.when(k == 0)
        def _():
            acc_ref[...] = jnp.zeros_like(acc_ref)

        acc_ref[...] += gram

        @pl.when(k == pl.num_programs(2) - 1)
        def _():
            _finalize(acc_ref[...])


def gaussian_kernel(x: jax.Array,
                    alpha: float = ALPHA,
                    *,
                    use_bf16_gram: bool = False,
                    dk_override: Optional[int] = None) -> jax.Array:
    """x: (N, D) float32 -> (N, N) float32 Gaussian kernel matrix."""
    n, d = x.shape
    x = x.astype(jnp.float32)

    # ---- padding: lanes/sublanes only (NOT up to the output tile) -----------
    n_pad = _round_up(n, 128)
    d_pad = _round_up(d, 128)
    x_p = jnp.zeros((n_pad, d_pad), jnp.float32).at[:n, :d].set(x)

    # ---- one pass over X: row norms feed both the kernel and sigma^2 --------
    row_norm = jnp.sum(x_p * x_p, axis=1)            # (Np,), zeros on padding
    # mean_ij ||xi - xj||^2 == 2 * (mean_i ||xi||^2 - ||mean_i xi||^2)
    mu = jnp.sum(x_p, axis=0) / n
    sigma_sq = alpha * 2.0 * (jnp.sum(row_norm) / n - jnp.dot(mu, mu))
    # Degenerate case (all rows identical): reference is NaN (0/0); clamp so
    # the kernel stays finite (output -> 1 everywhere, the analytic limit).
    sigma_sq = jnp.maximum(sigma_sq, jnp.float32(1e-30))
    scale = (-0.5 / sigma_sq).reshape(1, 1).astype(jnp.float32)

    norms_row = row_norm.reshape(n_pad, 1)           # (Np, 1)
    norms_col = row_norm.reshape(1, n_pad)           # (1, Np)

    # ---- tile selection ------------------------------------------------------
    vmem_limit = _vmem_limit_bytes()
    budget = int(vmem_limit * 0.8)                   # leave compiler headroom

    # Lane-dense output width; asymmetric row tile (largest divisor <= 1024).
    tn = 256 if n_pad % 256 == 0 else 128
    tm = tn
    for cand in (1024, 768, 512, 384, 256, 128):
        if cand <= n_pad and n_pad % cand == 0:
            tm = max(tm, cand)
            break

    # Feature (K) tiling only when full-D blocks would not fit the VMEM budget.
    fixed = (2 * tm * tn + tm * tn) * 4              # dbl-buffered out + acc
    per_dk = 2 * (tm + tn) * 4                       # dbl-buffered row+col blocks
    dk = min(d_pad, max(128, (budget - fixed) // per_dk // 128 * 128))
    while d_pad % dk != 0:
        dk -= 128
    if dk_override is not None:
        assert d_pad % dk_override == 0
        dk = dk_override
    k_steps = d_pad // dk

    grid = (n_pad // tm, n_pad // tn, k_steps)
    scratch = [pltpu.VMEM((tm, tn), jnp.float32)] if k_steps > 1 else []

    out = pl.pallas_call(
        functools.partial(_gaussian_tile_kernel, use_bf16_gram=use_bf16_gram),
        out_shape=jax.ShapeDtypeStruct((n_pad, n_pad), jnp.float32),
        grid=grid,
        in_specs=[
            pl.BlockSpec(memory_space=pltpu.MemorySpace.SMEM),   # scale (1,1)
            pl.BlockSpec((tm, dk), lambda i, j, k: (i, k)),      # X row block
            pl.BlockSpec((tn, dk), lambda i, j, k: (j, k)),      # X col block
            pl.BlockSpec((tm, 1), lambda i, j, k: (i, 0)),       # ||x_i||^2
            pl.BlockSpec((1, tn), lambda i, j, k: (0, j)),       # ||x_j||^2
        ],
        out_specs=pl.BlockSpec((tm, tn), lambda i, j, k: (i, j)),
        scratch_shapes=scratch,
        compiler_params=pltpu.CompilerParams(
            dimension_semantics=("parallel", "parallel", "arbitrary"),
            vmem_limit_bytes=vmem_limit,
        ),
    )(scale, x_p, x_p, norms_row, norms_col)

    return out[:n, :n]


def _reference(x: jax.Array, alpha: float = ALPHA) -> jax.Array:
    diff = x[None, :, :] - x[:, None, :]
    l2 = jnp.sum(diff * diff, axis=2)
    sigma_sq = alpha * jnp.mean(l2)
    return jnp.exp(-l2 / (2.0 * sigma_sq))


if __name__ == "__main__":
    key = jax.random.PRNGKey(0)

    # Small demo shape consistent with the module: 8 samples, 32 features.
    N, D = 8, 32
    x_small = jax.random.normal(key, (N, D), dtype=jnp.float32)
    out_small = jax.block_until_ready(gaussian_kernel(x_small))
    ref_small = jax.block_until_ready(_reference(x_small))
    np.testing.assert_allclose(np.asarray(out_small), np.asarray(ref_small),
                               rtol=1e-5, atol=1e-5)

    # Shape that exercises the multi-tile (i, j) grid with asymmetric tiles
    # (N=300 -> n_pad=384, tm=384, tn=128).
    key2 = jax.random.PRNGKey(1)
    N2, D2 = 300, 96
    x_big = jax.random.normal(key2, (N2, D2), dtype=jnp.float32)
    out_big = jax.block_until_ready(gaussian_kernel(x_big))
    ref_big = jax.block_until_ready(_reference(x_big))
    np.testing.assert_allclose(np.asarray(out_big), np.asarray(ref_big),
                               rtol=1e-4, atol=1e-5)

    # Exercise the K-axis accumulator path (forced dk=128 with D=256 -> K=2).
    key3 = jax.random.PRNGKey(2)
    N3, D3 = 256, 256
    x_k = jax.random.normal(key3, (N3, D3), dtype=jnp.float32)
    out_k = jax.block_until_ready(gaussian_kernel(x_k, dk_override=128))
    ref_k = jax.block_until_ready(_reference(x_k))
    np.testing.assert_allclose(np.asarray(out_k), np.asarray(ref_k),
                               rtol=1e-4, atol=1e-5)

    print("KERNEL_OK")
</pallas_src>

<mosaic_0001>
module attributes {stable_mosaic.version = 11 : i64} {
  func.func @_gaussian_tile_kernel(%arg0: i32, %arg1: i32, %arg2: i32, %arg3: memref<1x1xf32, #tpu.memory_space<smem>>, %arg4: memref<128x128xf32, #tpu.memory_space<vmem>>, %arg5: memref<128x128xf32, #tpu.memory_space<vmem>>, %arg6: memref<128x1xf32, #tpu.memory_space<vmem>>, %arg7: memref<1x128xf32, #tpu.memory_space<vmem>>, %arg8: memref<128x128xf32, #tpu.memory_space<vmem>>) attributes {dimension_semantics = [#tpu.dimension_semantics<parallel>, #tpu.dimension_semantics<parallel>, #tpu.dimension_semantics<arbitrary>], iteration_bounds = array<i64: 1, 1, 1>, scalar_prefetch = 0 : i64, scratch_operands = 0 : i64, tpu.core_type = #tpu.core_type<tc>, window_params = [{transform_indices = @transform_0, window_bounds = array<i64: 1, 1>}, {transform_indices = @transform_1, window_bounds = array<i64: 128, 128>}, {transform_indices = @transform_2, window_bounds = array<i64: 128, 128>}, {transform_indices = @transform_3, window_bounds = array<i64: 128, 1>}, {transform_indices = @transform_4, window_bounds = array<i64: 1, 128>}, {transform_indices = @transform_5, window_bounds = array<i64: 128, 128>}]} {
    %c0 = arith.constant 0 : index
    %c0_0 = arith.constant 0 : index
    %0 = vector.load %arg4[%c0, %c0_0] : memref<128x128xf32, #tpu.memory_space<vmem>>, vector<128x128xf32>
    %c0_1 = arith.constant 0 : index
    %c0_2 = arith.constant 0 : index
    %1 = vector.load %arg5[%c0_1, %c0_2] : memref<128x128xf32, #tpu.memory_space<vmem>>, vector<128x128xf32>
    %cst = arith.constant dense<0.000000e+00> : vector<128x128xf32>
    %2 = tpu.matmul %0, %1, %cst {dimension_numbers = #tpu.dot_dimension_numbers<[1], [1], [0], [0], [0, 0, 1, 0], [], []>} : vector<128x128xf32>, vector<128x128xf32>, vector<128x128xf32> -> vector<128x128xf32>
    %c0_3 = arith.constant 0 : index
    %c0_4 = arith.constant 0 : index
    %3 = vector.load %arg6[%c0_3, %c0_4] : memref<128x1xf32, #tpu.memory_space<vmem>>, vector<128x1xf32>
    %c0_5 = arith.constant 0 : index
    %c0_6 = arith.constant 0 : index
    %4 = vector.load %arg7[%c0_5, %c0_6] : memref<1x128xf32, #tpu.memory_space<vmem>>, vector<1x128xf32>
    %5 = vector.broadcast %3 : vector<128x1xf32> to vector<128x128xf32>
    %6 = vector.broadcast %4 : vector<1x128xf32> to vector<128x128xf32>
    %7 = arith.addf %5, %6 : vector<128x128xf32>
    %cst_7 = arith.constant 2.000000e+00 : f32
    %8 = vector.broadcast %cst_7 : f32 to vector<128x128xf32>
    %9 = arith.mulf %8, %2 : vector<128x128xf32>
    %10 = arith.subf %7, %9 : vector<128x128xf32>
    %cst_8 = arith.constant 0.000000e+00 : f32
    %11 = vector.broadcast %cst_8 : f32 to vector<128x128xf32>
    %12 = arith.maximumf %10, %11 : vector<128x128xf32>
    %c0_9 = arith.constant 0 : index
    %c0_10 = arith.constant 0 : index
    %13 = memref.load %arg3[%c0_9, %c0_10] : memref<1x1xf32, #tpu.memory_space<smem>>
    %14 = vector.broadcast %13 : f32 to vector<128x128xf32>
    %15 = arith.mulf %12, %14 : vector<128x128xf32>
    %16 = math.exp %15 : vector<128x128xf32>
    %c0_11 = arith.constant 0 : index
    %c0_12 = arith.constant 0 : index
    %17 = vector.load %arg8[%c0_11, %c0_12] : memref<128x128xf32, #tpu.memory_space<vmem>>, vector<128x128xf32>
    tpu.vector_store %arg8[%c0_11, %c0_12], %16 {strides = array<i32>} : memref<128x128xf32, #tpu.memory_space<vmem>>, vector<128x128xf32>,
    return
  }
  func.func @transform_0(%arg0: i32, %arg1: i32, %arg2: i32) -> (i32, i32) {
    %c0_i32 = arith.constant 0 : i32
    %c0_i32_0 = arith.constant 0 : i32
    %c0_i32_1 = arith.constant 0 : i32
    return %c0_i32, %c0_i32_0 : i32, i32
  }
  func.func @transform_1(%arg0: i32, %arg1: i32, %arg2: i32) -> (i32, i32) {
    %c0_i32 = arith.constant 0 : i32
    return %arg0, %arg2 : i32, i32
  }
  func.func @transform_2(%arg0: i32, %arg1: i32, %arg2: i32) -> (i32, i32) {
    %c0_i32 = arith.constant 0 : i32
    return %arg1, %arg2 : i32, i32
  }
  func.func @transform_3(%arg0: i32, %arg1: i32, %arg2: i32) -> (i32, i32) {
    %c0_i32 = arith.constant 0 : i32
    %c0_i32_0 = arith.constant 0 : i32
    return %arg0, %c0_i32 : i32, i32
  }
  func.func @transform_4(%arg0: i32, %arg1: i32, %arg2: i32) -> (i32, i32) {
    %c0_i32 = arith.constant 0 : i32
    %c0_i32_0 = arith.constant 0 : i32
    return %c0_i32, %arg1 : i32, i32
  }
  func.func @transform_5(%arg0: i32, %arg1: i32, %arg2: i32) -> (i32, i32) {
    %c0_i32 = arith.constant 0 : i32
    return %arg0, %arg1 : i32, i32
  }
}

</mosaic_0001>

<bundles_post_ra>
// kernel: tpu_custom_call.1
= control target key start
LH: loop header
LB: loop body
LE: loop exit
PB: predicated region body
PF: predicated region fallthrough
CT: control target
= control target key end

     0   :  { %11 = vsyncpa [#allocation4], 0  ;;  %s896_s0 = inlined_call_operand.<no memory space> [shape: f32[1,1], index: 0, kind: input, shape index: {}]   ;;  %s897_s1 = inlined_call_operand.vmem [shape: f32[128,128], index: 1, kind: input, shape index: {}]   ;;  %s898_s2 = inlined_call_operand.hbm [shape: f32[128,128], index: 2, kind: input, shape index: {}]   ;;  %s899_s3 = inlined_call_operand.vmem [shape: f32[128,1], index: 3, kind: input, shape index: {}]   ;;  %s900_s4 = inlined_call_operand.vmem [shape: f32[1,128], index: 4, kind: input, shape index: {}]   ;;  %s901_s5 = inlined_call_operand.hbm [shape: f32[128,128], index: 5, kind: output, shape index: {}]  }
   0x1   :  { %12 = vsyncpa [#allocation5], 0  ;;  %s687_s18 = smov [#allocation3]   ;;  %s639_s22 = scalar_lea.hbm %s898_s2, 2048 }
   0x2   :  { %s22_s19 = sshll.u32 %s687_s18, 4  ;;  %p640_p0 = scmp.ne.s32.totalorder %s898_s2, %s639_s22  ;;  %s23_s19 = int_to_ptr.vmem [resolvable:$true] %s22_s19 }
   0x3   :  { %p643_p1 = scmp.lt.u32.totalorder %s639_s22, %s898_s2 }
   0x5   :  { %p645_p2 = pnand %p643_p1, %p640_p0 }
   0x7   :  { %648 = shalt.err (!%p645_p2)
}
   0x8   :  { %s649_s27 = scalar_lea.vmem %s23_s19, 2048  ;;  %p654_p4 = scmp.lt.s32.totalorder %s23_s19, %s23_s19 }
   0x9   :  { %p650_p3 = scmp.ne.s32.totalorder %s23_s19, %s649_s27  ;;  %p655_p5 = scmp.lt.s32.totalorder %s649_s27, %s649_s27 }
   0xb   :  { %p656_p6 = por %p655_p5, %p654_p4 }
   0xd   :  { %p657_p7 = pnand %p656_p6, %p650_p3 }
   0xf   :  { %660 = shalt.err (!%p657_p7)
}
  0x10   :  { %s688_s28 = smov 128   ;;  %s689_s29 = smov 8  }
  0x11   :  { %28 = dma.hbm_to_vmem [thread:$0]  %s898_s2, 2048, %s23_s19, [#allocation4], %s688_s28, %s688_s28, %s689_s29  }
  0x12   :  { %683 = dma.done.wait [#allocation4], 2048  }
  0x13   :  { %684 = vsyncadd [#allocation4], 4294965248  ;;  %v690_v0 = vmov 0   ;;  %v52_v1 = vld [vmem:[#allocation3] sm:$0xff]  ;;  %v53_v2 = vld [vmem:[#allocation3 + $0x8] sm:$0xff] }
  0x14   :  { %606 = vset.pattern.permute.xlu1 %v690_v0  ;;  %605 = vset.pattern.permute.xlu0 %v690_v0  ;;  %v54_v3 = vld [vmem:[#allocation3 + $0x10] sm:$0xff]  ;;  %v552_v4 = vpack.c.bf16 %v53_v2, %v52_v1  ;;  %v55_v5 = vld [vmem:[#allocation3 + $0x18] sm:$0xff]  ;;  %v36_v7 = vld [vmem:[%s897_s1] sm:$0xff] }
  0x15   :  { %v556_v6 = vpack.c.bf16 %v55_v5, %v54_v3  ;;  %v44_v8 = vld [vmem:[%s897_s1 + $0x40] sm:$0xff]  ;;  %v57_v10 = vld [vmem:[#allocation3 + $0x28] sm:$0xff]  ;;  %528 = vmatprep.mubr.f32.mxu0 %v36_v7  ;;  %v215_v12 = vld [vmem:[%s899_s3 + $0x10] sm:$0xff] }
  0x16   :  { %553 = vmatprep.subr.bf16.mxu0 %v552_v4  ;;  %584 = vmatprep.subr.bf16.mxu1 %v552_v4  ;;  %v56_v9 = vld [vmem:[#allocation3 + $0x20] sm:$0xff]  ;;  %v216_v14 = vld [vmem:[%s899_s3 + $0x18] sm:$0xff]  ;;  %v58_v15 = vld [vmem:[#allocation3 + $0x30] sm:$0xff] }
  0x17   :  { %555 = vmatpush3.bf16.xpose.msra.mxu0 %v552_v4  ;;  %592 = vmatpush3.bf16.xpose.msra.mxu1 %v552_v4  ;;  %v560_v11 = vpack.c.bf16 %v57_v10, %v56_v9  ;;  %v213_v13 = vld [vmem:[%s899_s3] sm:$0xff]  ;;  %v59_v16 = vld [vmem:[#allocation3 + $0x38] sm:$0xff]  ;;  %v214_v17 = vld [vmem:[%s899_s3 + $0x8] sm:$0xff] }
  0x18   :  { %557 = vmatprep.subr.bf16.mxu0 %v556_v6  ;;  %585 = vmatprep.subr.bf16.mxu1 %v556_v6  ;;  %v218_v18 = vld [vmem:[%s899_s3 + $0x28] sm:$0xff]  ;;  %v564_v19 = vpack.c.bf16 %v59_v16, %v58_v15  ;;  %v217_v20 = vld [vmem:[%s899_s3 + $0x20] sm:$0xff]  ;;  %v220_v21 = vld [vmem:[%s899_s3 + $0x38] sm:$0xff] }
  0x19   :  { %540 = vmatprep.mubr.f32.mxu1 %v44_v8  ;;  %242 = vperm.xlu1 %606, %v215_v12   ;;  %v60_v22 = vld [vmem:[#allocation3 + $0x40] sm:$0xff]  ;;  %v61_v23 = vld [vmem:[#allocation3 + $0x48] sm:$0xff]  ;;  %v219_v24 = vld [vmem:[%s899_s3 + $0x30] sm:$0xff] }
  0x1a   :  { %232 = vperm.xlu0 %605, %v213_v13   ;;  %v222_v25 = vld [vmem:[%s899_s3 + $0x48] sm:$0xff]  ;;  %v568_v26 = vpack.c.bf16 %v61_v23, %v60_v22  ;;  %v221_v27 = vld [vmem:[%s899_s3 + $0x40] sm:$0xff]  ;;  %v224_v28 = vld [vmem:[%s899_s3 + $0x58] sm:$0xff]  ;;  %v847_v23 = vstv %s896_s0  ;;  %s691_s0 = smov [#allocation6]  }
  0x1b   :  { %v62_v29 = vld [vmem:[#allocation3 + $0x50] sm:$0xff]  ;;  %v63_v30 = vld [vmem:[#allocation3 + $0x58] sm:$0xff]  ;;  %v226_v32 = vld [vmem:[%s899_s3 + $0x68] sm:$0xff]  ;;  %s451_s22 = sshll.u32 %s691_s0, 4  ;;  %s452_s22 = int_to_ptr.vmem [resolvable:$true] %s451_s22 }
  0x1c   :  { %v223_v31 = vld [vmem:[%s899_s3 + $0x50] sm:$0xff]  ;;  %v572_v33 = vpack.c.bf16 %v63_v30, %v62_v29  ;;  %v225_v34 = vld [vmem:[%s899_s3 + $0x60] sm:$0xff]  ;;  %v228_v35 = vld [vmem:[%s899_s3 + $0x78] sm:$0xff]  ;;  %s661_s23 = scalar_lea.vmem %s452_s22, 2048  ;;  %p666_p9 = scmp.lt.s32.totalorder %s452_s22, %s452_s22 }
  0x1d   :  { %247 = vperm.xlu1 %606, %v216_v14   ;;  %v64_v36 = vld [vmem:[#allocation3 + $0x60] sm:$0xff]  ;;  %v65_v37 = vld [vmem:[#allocation3 + $0x68] sm:$0xff]  ;;  %v227_v38 = vld [vmem:[%s899_s3 + $0x70] sm:$0xff]  ;;  %p662_p8 = scmp.ne.s32.totalorder %s452_s22, %s661_s23  ;;  %p667_p10 = scmp.lt.s32.totalorder %s661_s23, %s661_s23 }
  0x1e   :  { %237 = vperm.xlu0 %605, %v214_v17   ;;  %v576_v39 = vpack.c.bf16 %v65_v37, %v64_v36  ;;  %v66_v40 = vld [vmem:[#allocation3 + $0x70] sm:$0xff]  ;;  %v67_v41 = vld [vmem:[#allocation3 + $0x78] sm:$0xff]  ;;  %v37_v43 = vld [vmem:[%s897_s1 + $0x8] sm:$0xff] }
  0x1f   :  { %559 = vmatpush3.bf16.xpose.msra.mxu0 %v556_v6  ;;  %593 = vmatpush3.bf16.xpose.msra.mxu1 %v556_v6  ;;  %v580_v42 = vpack.c.bf16 %v67_v41, %v66_v40  ;;  %v45_v44 = vld [vmem:[%s897_s1 + $0x48] sm:$0xff]  ;;  %v38_v45 = vld [vmem:[%s897_s1 + $0x10] sm:$0xff]  ;;  %v39_v47 = vld [vmem:[%s897_s1 + $0x18] sm:$0xff]  ;;  %p668_p11 = por %p667_p10, %p666_p9 }
  0x20   :  { %561 = vmatprep.subr.bf16.mxu0 %v560_v11  ;;  %586 = vmatprep.subr.bf16.mxu1 %v560_v11  ;;  %v46_v46 = vld [vmem:[%s897_s1 + $0x50] sm:$0xff]  ;;  %v47_v48 = vld [vmem:[%s897_s1 + $0x58] sm:$0xff]  ;;  %v40_v49 = vld [vmem:[%s897_s1 + $0x20] sm:$0xff] }
  0x21   :  { %257 = vperm.xlu1 %606, %v218_v18   ;;  %v48_v50 = vld [vmem:[%s897_s1 + $0x60] sm:$0xff]  ;;  %v41_v51 = vld [vmem:[%s897_s1 + $0x28] sm:$0xff]  ;;  %v42_v53 = vld [vmem:[%s897_s1 + $0x30] sm:$0xff]  ;;  %p669_p12 = pnand %p668_p11, %p662_p8 }
  0x22   :  { %252 = vperm.xlu0 %605, %v217_v20   ;;  %v49_v52 = vld [vmem:[%s897_s1 + $0x68] sm:$0xff]  ;;  %v50_v54 = vld [vmem:[%s897_s1 + $0x70] sm:$0xff]  ;;  %v43_v55 = vld [vmem:[%s897_s1 + $0x38] sm:$0xff] }
  0x23   :  { %v51_v56 = vld [vmem:[%s897_s1 + $0x78] sm:$0xff]  ;;  %v463_v7 = vld [vmem:[%s900_s4] ss:$0 sm:$0xff] }
  0x25   :  { %267 = vperm.xlu1 %606, %v220_v21  }
  0x26   :  { %262 = vperm.xlu0 %605, %v219_v24  }
  0x27   :  { %563 = vmatpush3.bf16.xpose.msra.mxu0 %v560_v11  ;;  %594 = vmatpush3.bf16.xpose.msra.mxu1 %v560_v11 }
  0x28   :  { %565 = vmatprep.subr.bf16.mxu0 %v564_v19  ;;  %587 = vmatprep.subr.bf16.mxu1 %v564_v19 }
  0x29   :  { %277 = vperm.xlu1 %606, %v222_v25  }
  0x2a   :  { %272 = vperm.xlu0 %605, %v221_v27  }
  0x2d   :  { %287 = vperm.xlu1 %606, %v224_v28  }
  0x2e   :  { %282 = vperm.xlu0 %605, %v223_v31  }
  0x2f   :  { %567 = vmatpush3.bf16.xpose.msra.mxu0 %v564_v19  ;;  %595 = vmatpush3.bf16.xpose.msra.mxu1 %v564_v19 }
  0x30   :  { %569 = vmatprep.subr.bf16.mxu0 %v568_v26  ;;  %588 = vmatprep.subr.bf16.mxu1 %v568_v26 }
  0x31   :  { %297 = vperm.xlu1 %606, %v226_v32  }
  0x32   :  { %292 = vperm.xlu0 %605, %v225_v34  }
  0x35   :  { %307 = vperm.xlu1 %606, %v228_v35  }
  0x36   :  { %302 = vperm.xlu0 %605, %v227_v38  }
  0x37   :  { %571 = vmatpush3.bf16.xpose.msra.mxu0 %v568_v26  ;;  %596 = vmatpush3.bf16.xpose.msra.mxu1 %v568_v26 }
  0x38   :  { %573 = vmatprep.subr.bf16.mxu0 %v572_v33  ;;  %589 = vmatprep.subr.bf16.mxu1 %v572_v33 }
  0x3f   :  { %575 = vmatpush3.bf16.xpose.msra.mxu0 %v572_v33  ;;  %597 = vmatpush3.bf16.xpose.msra.mxu1 %v572_v33 }
  0x40   :  { %577 = vmatprep.subr.bf16.mxu0 %v576_v39  ;;  %590 = vmatprep.subr.bf16.mxu1 %v576_v39 }
  0x47   :  { %579 = vmatpush3.bf16.xpose.msra.mxu0 %v576_v39  ;;  %598 = vmatpush3.bf16.xpose.msra.mxu1 %v576_v39 }
  0x48   :  { %581 = vmatprep.subr.bf16.mxu0 %v580_v42  ;;  %591 = vmatprep.subr.bf16.mxu1 %v580_v42 }
  0x4f   :  { %583 = vmatpush3.bf16.xpose.msra.mxu0 %v580_v42  ;;  %599 = vmatpush3.bf16.xpose.msra.mxu1 %v580_v42 }
  0x56   :  { %529 = vmatmul.mubr.f32.vlgmr.msra.gmra.mrb[0].mxu0 %v37_v43  ;;  %541 = vmatmul.mubr.f32.vlgmr.msra.gmra.mrb[0].mxu1 %v45_v44 }
  0x57   :  { %531 = vmatprep.mubr.f32.mxu0 %v38_v45  ;;  %543 = vmatprep.mubr.f32.mxu1 %v46_v46 }
  0x5a   :  { %532 = vmatmul.mubr.f32.gmra.mrb[2].mxu0 %v39_v47  ;;  %544 = vmatmul.mubr.f32.gmra.mrb[2].mxu1 %v47_v48 }
  0x5b   :  { %534 = vmatprep.mubr.f32.mxu0 %v40_v49  ;;  %546 = vmatprep.mubr.f32.mxu1 %v48_v50 }
  0x5e   :  { %535 = vmatmul.mubr.f32.gmra.mrb[4].mxu0 %v41_v51  ;;  %547 = vmatmul.mubr.f32.gmra.mrb[4].mxu1 %v49_v52 }
  0x5f   :  { %537 = vmatprep.mubr.f32.mxu0 %v42_v53  ;;  %549 = vmatprep.mubr.f32.mxu1 %v50_v54 }
  0x62   :  { %538 = vmatmul.mubr.f32.gmra.mrb[6].mxu0 %v43_v55  ;;  %550 = vmatmul.mubr.f32.gmra.mrb[6].mxu1 %v51_v56 }
  0x98   :  { %v243_v57 = vpop.permute.xlu1 %242 }
  0x99   :  { %v233_v58 = vpop.permute.xlu0 %232  ;;  %v318_v8 = vadd.f32 %v463_v7, %v243_v57 }
  0x9a   :  { %v316_v9 = vadd.f32 %v463_v7, %v233_v58 }
  0x9c   :  { %v248_v59 = vpop.permute.xlu1 %247 }
  0x9d   :  { %v238_v60 = vpop.permute.xlu0 %237  ;;  %v319_v10 = vadd.f32 %v463_v7, %v248_v59 }
  0x9e   :  { %v317_v11 = vadd.f32 %v463_v7, %v238_v60 }
  0xa0   :  { %v258_v61 = vpop.permute.xlu1 %257 }
  0xa1   :  { %v253_v62 = vpop.permute.xlu0 %252  ;;  %v836_v12 = vadd.f32 %v463_v7, %v258_v61 }
  0xa2   :  { %v838_v15 = vadd.f32 %v463_v7, %v253_v62 }
  0xa4   :  { %v268_v63 = vpop.permute.xlu1 %267 }
  0xa5   :  { %v263_v0 = vpop.permute.xlu0 %262  ;;  %v840_v16 = vadd.f32 %v463_v7, %v268_v63 }
  0xa6   :  { %v842_v17 = vadd.f32 %v463_v7, %v263_v0 }
  0xa8   :  { %v278_v1 = vpop.permute.xlu1 %277 }
  0xa9   :  { %v273_v2 = vpop.permute.xlu0 %272  ;;  %v325_v18 = vadd.f32 %v463_v7, %v278_v1 }
  0xaa   :  { %v324_v21 = vadd.f32 %v463_v7, %v273_v2 }
  0xac   :  { %v288_v3 = vpop.permute.xlu1 %287 }
  0xad   :  { %v283_v4 = vpop.permute.xlu0 %282  ;;  %v327_v27 = vadd.f32 %v463_v7, %v288_v3 }
  0xae   :  { %v326_v28 = vadd.f32 %v463_v7, %v283_v4 }
  0xb0   :  { %v298_v5 = vpop.permute.xlu1 %297 }
  0xb1   :  { %v293_v6 = vpop.permute.xlu0 %292  ;;  %v849_v31 = vadd.f32 %v463_v7, %v298_v5 }
  0xb2   :  { %v851_v32 = vadd.f32 %v463_v7, %v293_v6 }
  0xb4   :  { %v308_v13 = vpop.permute.xlu1 %307 }
  0xb5   :  { %v303_v14 = vpop.permute.xlu0 %302  ;;  %v853_v35 = vadd.f32 %v463_v7, %v308_v13 }
  0xb6   :  { %v855_v36 = vadd.f32 %v463_v7, %v303_v14 }
 0x129   :  { %v530_v19 = vpop.f32.mrb[0].mxu0  ;;  %v542_v20 = vpop.f32.mrb[0].mxu1 }
 0x12a   :  { %v333_v22 = vmul.f32 2.0, %v530_v19  ;;  %v341_v24 = vmul.f32 2.0, %v542_v20  ;;  %v134_v25 = vpop.f32.mrb[1].mxu0  ;;  %v174_v26 = vpop.f32.mrb[1].mxu1 }
 0x12b   :  { %v332_v29 = vmul.f32 2.0, %v134_v25  ;;  %v340_v30 = vmul.f32 2.0, %v174_v26 }
 0x12c   :  { %v349_v33 = vsub.f32 %v317_v11, %v333_v22  ;;  %v357_v34 = vsub.f32 %v325_v18, %v341_v24 }
 0x12d   :  { %v348_v37 = vsub.f32 %v316_v9, %v332_v29  ;;  %v356_v38 = vsub.f32 %v324_v21, %v340_v30  ;;  %v533_v39 = vpop.f32.mrb[2].mxu0  ;;  %v545_v40 = vpop.f32.mrb[2].mxu1 }
 0x12e   :  { %v365_v41 = vmax.f32 %v349_v33, 0.0  ;;  %v373_v42 = vmax.f32 %v357_v34, 0.0  ;;  %v335_v43 = vmul.f32 2.0, %v533_v39  ;;  %v343_v44 = vmul.f32 2.0, %v545_v40  ;;  %v144_v45 = vpop.f32.mrb[3].mxu0  ;;  %v184_v46 = vpop.f32.mrb[3].mxu1 }
 0x12f   :  { %v364_v47 = vmax.f32 %v348_v37, 0.0  ;;  %v372_v48 = vmax.f32 %v356_v38, 0.0  ;;  %v334_v49 = vmul.f32 2.0, %v144_v45  ;;  %v342_v50 = vmul.f32 2.0, %v184_v46 }
 0x130   :  { %v383_v51 = vmul.f32 %v847_v23, %v365_v41  ;;  %v391_v52 = vmul.f32 %v847_v23, %v373_v42  ;;  %v351_v53 = vsub.f32 %v319_v10, %v335_v43  ;;  %v359_v54 = vsub.f32 %v327_v27, %v343_v44 }
 0x131   :  { %v382_v55 = vmul.f32 %v847_v23, %v364_v47  ;;  %v390_v56 = vmul.f32 %v847_v23, %v372_v48  ;;  %v350_v57 = vsub.f32 %v318_v8, %v334_v49  ;;  %v358_v58 = vsub.f32 %v326_v28, %v342_v50  ;;  %v536_v59 = vpop.f32.mrb[4].mxu0  ;;  %v548_v60 = vpop.f32.mrb[4].mxu1 }
 0x132   :  { %v400_v61 = vmul.f32 1.442695, %v383_v51  ;;  %v416_v62 = vmul.f32 1.442695, %v391_v52  ;;  %v367_v63 = vmax.f32 %v351_v53, 0.0  ;;  %v375_v0 = vmax.f32 %v359_v54, 0.0 }
 0x133   :  { %v398_v1 = vmul.f32 1.442695, %v382_v55  ;;  %v414_v2 = vmul.f32 1.442695, %v390_v56  ;;  %v366_v3 = vmax.f32 %v350_v57, 0.0  ;;  %v374_v4 = vmax.f32 %v358_v58, 0.0 }
 0x134   :  { %607 = vpow2.f32 %v400_v61  ;;  %v385_v5 = vmul.f32 %v847_v23, %v367_v63  ;;  %v393_v6 = vmul.f32 %v847_v23, %v375_v0  ;;  %v337_v7 = vmul.f32 2.0, %v536_v59  ;;  %v154_v9 = vpop.f32.mrb[5].mxu0  ;;  %v194_v10 = vpop.f32.mrb[5].mxu1 }
 0x135   :  { %609 = vpow2.f32 %v416_v62  ;;  %v384_v8 = vmul.f32 %v847_v23, %v366_v3  ;;  %v392_v11 = vmul.f32 %v847_v23, %v374_v4  ;;  %v345_v13 = vmul.f32 2.0, %v548_v60  ;;  %v539_v14 = vpop.f32.mrb[6].mxu0  ;;  %v551_v18 = vpop.f32.mrb[6].mxu1 }
 0x136   :  { %611 = vpow2.f32 %v398_v1  ;;  %v404_v19 = vmul.f32 1.442695, %v385_v5  ;;  %v420_v20 = vmul.f32 1.442695, %v393_v6  ;;  %v353_v21 = vsub.f32 %v836_v12, %v337_v7  ;;  %v164_v22 = vpop.f32.mrb[7].mxu0  ;;  %v204_v24 = vpop.f32.mrb[7].mxu1 }
 0x137   :  { %613 = vpow2.f32 %v414_v2  ;;  %v402_v25 = vmul.f32 1.442695, %v384_v8  ;;  %v418_v26 = vmul.f32 1.442695, %v392_v11  ;;  %v361_v27 = vsub.f32 %v849_v31, %v345_v13 }
 0x138   :  { %615 = vpow2.f32 %v404_v19  ;;  %v369_v28 = vmax.f32 %v353_v21, 0.0  ;;  %v336_v29 = vmul.f32 2.0, %v154_v9  ;;  %v344_v30 = vmul.f32 2.0, %v194_v10 }
 0x139   :  { %617 = vpow2.f32 %v420_v20  ;;  %v377_v33 = vmax.f32 %v361_v27, 0.0  ;;  %v339_v34 = vmul.f32 2.0, %v539_v14  ;;  %v347_v37 = vmul.f32 2.0, %v551_v18 }
 0x13a   :  { %619 = vpow2.f32 %v402_v25  ;;  %v387_v38 = vmul.f32 %v847_v23, %v369_v28  ;;  %v352_v12 = vsub.f32 %v838_v15, %v336_v29  ;;  %v360_v39 = vsub.f32 %v851_v32, %v344_v30 }
 0x13b   :  { %621 = vpow2.f32 %v418_v26  ;;  %v395_v40 = vmul.f32 %v847_v23, %v377_v33  ;;  %v355_v31 = vsub.f32 %v840_v16, %v339_v34  ;;  %v363_v41 = vsub.f32 %v853_v35, %v347_v37 }
 0x13c   :  { %v408_v42 = vmul.f32 1.442695, %v387_v38  ;;  %v368_v43 = vmax.f32 %v352_v12, 0.0  ;;  %v376_v44 = vmax.f32 %v360_v39, 0.0  ;;  %v338_v45 = vmul.f32 2.0, %v164_v22 }
 0x13d   :  { %v424_v46 = vmul.f32 1.442695, %v395_v40  ;;  %v371_v47 = vmax.f32 %v355_v31, 0.0  ;;  %v379_v48 = vmax.f32 %v363_v41, 0.0  ;;  %v346_v49 = vmul.f32 2.0, %v204_v24 }
 0x13e   :  { %v608_v50 = vpop.eup %607  ;;  %623 = vpow2.f32 %v408_v42  ;;  %v386_v15 = vmul.f32 %v847_v23, %v368_v43  ;;  %v394_v32 = vmul.f32 %v847_v23, %v376_v44  ;;  %v354_v51 = vsub.f32 %v842_v17, %v338_v45 }
 0x13f   :  { %v610_v52 = vpop.eup %609  ;;  %431 = vst [vmem:[#allocation6 + $0x8] sm:$0xff] %v608_v50  ;;  %625 = vpow2.f32 %v424_v46  ;;  %v389_v16 = vmul.f32 %v847_v23, %v371_v47  ;;  %v397_v35 = vmul.f32 %v847_v23, %v379_v48  ;;  %v362_v53 = vsub.f32 %v855_v36, %v346_v49 }
 0x140   :  { %v612_v54 = vpop.eup %611  ;;  %439 = vst [vmem:[#allocation6 + $0x48] sm:$0xff] %v610_v52  ;;  %v406_v55 = vmul.f32 1.442695, %v386_v15  ;;  %v422_v56 = vmul.f32 1.442695, %v394_v32  ;;  %v370_v57 = vmax.f32 %v354_v51, 0.0 }
 0x141   :  { %v614_v58 = vpop.eup %613  ;;  %430 = vst [vmem:[#allocation6] sm:$0xff] %v612_v54  ;;  %v412_v59 = vmul.f32 1.442695, %v389_v16  ;;  %v428_v60 = vmul.f32 1.442695, %v397_v35  ;;  %v378_v61 = vmax.f32 %v362_v53, 0.0 }
 0x142   :  { %v616_v17 = vpop.eup %615  ;;  %438 = vst [vmem:[#allocation6 + $0x40] sm:$0xff] %v614_v58  ;;  %627 = vpow2.f32 %v406_v55  ;;  %v388_v62 = vmul.f32 %v847_v23, %v370_v57 }
 0x143   :  { %v618_v63 = vpop.eup %617  ;;  %433 = vst [vmem:[#allocation6 + $0x18] sm:$0xff] %v616_v17  ;;  %629 = vpow2.f32 %v422_v56  ;;  %v396_v36 = vmul.f32 %v847_v23, %v378_v61 }
 0x144   :  { %v620_v0 = vpop.eup %619  ;;  %441 = vst [vmem:[#allocation6 + $0x58] sm:$0xff] %v618_v63  ;;  %631 = vpow2.f32 %v412_v59  ;;  %v410_v1 = vmul.f32 1.442695, %v388_v62 }
 0x145   :  { %v622_v2 = vpop.eup %621  ;;  %432 = vst [vmem:[#allocation6 + $0x10] sm:$0xff] %v620_v0  ;;  %633 = vpow2.f32 %v428_v60  ;;  %v426_v3 = vmul.f32 1.442695, %v396_v36 }
 0x146   :  { %440 = vst [vmem:[#allocation6 + $0x50] sm:$0xff] %v622_v2  ;;  %635 = vpow2.f32 %v410_v1 }
 0x147   :  { %637 = vpow2.f32 %v426_v3 }
 0x148   :  { %v624_v4 = vpop.eup %623 }
 0x149   :  { %v626_v5 = vpop.eup %625  ;;  %435 = vst [vmem:[#allocation6 + $0x28] sm:$0xff] %v624_v4 }
 0x14a   :  { %443 = vst [vmem:[#allocation6 + $0x68] sm:$0xff] %v626_v5 }
 0x14c   :  { %v628_v6 = vpop.eup %627 }
 0x14d   :  { %v630_v7 = vpop.eup %629  ;;  %434 = vst [vmem:[#allocation6 + $0x20] sm:$0xff] %v628_v6 }
 0x14e   :  { %v632_v23 = vpop.eup %631  ;;  %442 = vst [vmem:[#allocation6 + $0x60] sm:$0xff] %v630_v7 }
 0x14f   :  { %v634_v9 = vpop.eup %633  ;;  %437 = vst [vmem:[#allocation6 + $0x38] sm:$0xff] %v632_v23 }
 0x150   :  { %v636_v10 = vpop.eup %635  ;;  %445 = vst [vmem:[#allocation6 + $0x78] sm:$0xff] %v634_v9 }
 0x151   :  { %v638_v8 = vpop.eup %637  ;;  %436 = vst [vmem:[#allocation6 + $0x30] sm:$0xff] %v636_v10 }
 0x152   :  { %444 = vst [vmem:[#allocation6 + $0x70] sm:$0xff] %v638_v8 }
 0x153   :  { %672 = shalt.err (!%p669_p12)
}
 0x154   :  { %s673_s26 = scalar_lea.hbm %s901_s5, 2048 }
 0x155   :  { %p674_p13 = scmp.ne.s32.totalorder %s901_s5, %s673_s26  ;;  %p677_p0 = scmp.lt.u32.totalorder %s673_s26, %s901_s5 }
 0x157   :  { %p679_p1 = pnand %p677_p0, %p674_p13 }
 0x159   :  { %682 = shalt.err (!%p679_p1)
}
 0x15a   :  { %457 = dma.vmem_to_hbm [thread:$0]  %s452_s22, 2048, %s901_s5, [#allocation5], %s688_s28, %s688_s28, %s689_s29  }
 0x15b   :  { %685 = dma.done.wait [#allocation5], 2048  }
 0x15c   :  { %686 = vsyncadd [#allocation5], 4294965248 }
 0x15d   :  { %461 = vsyncpa [#allocation4], 1 }
 0x15e   :  { %462 = vsyncpa [#allocation5], 1 }

</bundles_post_ra>
